<compile_context>
chip_gen: v7x
topology: tpu7x:2x2x1
jax: 0.10.0
libtpu: 0.0.40
codegen_flags: <defaults>
</compile_context>

<pallas_src>
import functools

import jax
import jax.numpy as jnp
from jax.experimental import pallas as pl
from jax.experimental.pallas import tpu as pltpu


def _round_up(v, m):
    return (v + m - 1) // m * m


def _cdiv(a, b):
    return -(-a // b)


def _encoder_kernel(x_ref, w1_ref, b1_ref, w2_ref, b2_ref, w3_ref, b3_ref,
                    out_ref):
    # Cast x f32 -> bf16 inside the kernel (VPU, hidden under the DMA/MXU);
    # the wrapper no longer does a separate HBM cast pass.
    x = x_ref[...].astype(w1_ref.dtype)

    # fc1 + SiLU   (dropout = identity in eval mode)
    h = jnp.dot(x, w1_ref[...],
                preferred_element_type=jnp.float32) + b1_ref[...]
    h = h * jax.nn.sigmoid(h)                       # f32 SiLU (EUP slot)

    # fc2 + SiLU
    h = jnp.dot(h.astype(w2_ref.dtype), w2_ref[...],
                preferred_element_type=jnp.float32) + b2_ref[...]
    h = h * jax.nn.sigmoid(h)

    # fused + lane-padded heads: one matmul producing [mu | logvar | 0-pad]
    y = jnp.dot(h.astype(w3_ref.dtype), w3_ref[...],
                preferred_element_type=jnp.float32) + b3_ref[...]
    out_ref[...] = y.astype(out_ref.dtype)          # full 128-lane store


def prepare_params(params):
    """One-time weight prep (do NOT call per inference step):
    fuse the mu/logvar heads, zero-pad the fused head to a multiple of 128
    output lanes, and cast weights to bf16 (biases stay f32).

    Returns (prep_dict, z_dim)."""
    cdt = jnp.bfloat16
    z_dim = params["w31"].shape[1]
    out_dim = 2 * z_dim
    out_pad = _round_up(out_dim, 128)

    w3 = jnp.concatenate([params["w31"], params["w32"]], axis=1)
    b3 = jnp.concatenate([params["b31"], params["b32"]], axis=1)
    pad = out_pad - out_dim
    if pad:
        w3 = jnp.pad(w3, ((0, 0), (0, pad)))
        b3 = jnp.pad(b3, ((0, 0), (0, pad)))

    prep = dict(
        w1=params["w1"].astype(cdt), b1=params["b1"].astype(jnp.float32),
        w2=params["w2"].astype(cdt), b2=params["b2"].astype(jnp.float32),
        w3=w3.astype(cdt), b3=b3.astype(jnp.float32),
    )
    return prep, z_dim


@functools.partial(
    jax.jit, static_argnames=("z_dim", "num_batch_tiles", "max_block_rows"))
def abundance_encoder(x, prep, *, z_dim, num_batch_tiles=2,
                      max_block_rows=1024):
    """x: (..., x_dim) f32. prep: output of prepare_params.

    Returns (mu, logvar), each (B, z_dim), in x.dtype.
    num_batch_tiles: target number of grid steps (2 fills both v7x TCs; on
    single-TC v5e/v6e the extra step costs ~0.35 us)."""
    x_dim, h_dim = prep["w1"].shape
    out_pad = prep["w3"].shape[1]

    x = x.reshape(-1, x_dim)                        # matches x.view(-1, x_dim)
    B = x.shape[0]

    # ---- batch tiling: 128-aligned tile, ~num_batch_tiles grid steps ----
    B_pad_min = _round_up(B, 128)
    bb = _round_up(_cdiv(B_pad_min, num_batch_tiles), 128)
    bb = max(128, min(bb, _round_up(max_block_rows, 128), B_pad_min))
    B_pad = _round_up(B, bb)
    if B_pad != B:
        x = jnp.pad(x, ((0, B_pad - B), (0, 0)))
    grid = (B_pad // bb,)

    rowmap = lambda i: (i, 0)          # batch-tiled arrays
    fixmap = lambda i: (0, 0)          # index-invariant weights / biases
    w_spec = lambda shp: pl.BlockSpec(shp, fixmap)

    # ---- honest VMEM budget (no 32/64 MiB clamps) + cost hint ----
    out_elt = jnp.dtype(x.dtype).itemsize
    x_elt = jnp.dtype(x.dtype).itemsize
    w_bytes = 2 * (x_dim * h_dim + h_dim * h_dim + h_dim * out_pad)   # bf16
    b_bytes = 4 * (2 * h_dim + out_pad)
    tile_bytes = bb * (x_elt * x_dim + out_elt * out_pad)
    vmem_needed = w_bytes + b_bytes + 2 * tile_bytes   # x/out double-buffered
    vmem_limit = int(min(max(2 * vmem_needed + (2 << 20), 4 << 20), 96 << 20))

    cost = pl.CostEstimate(
        flops=2 * B_pad * (x_dim * h_dim + h_dim * h_dim + h_dim * out_pad),
        transcendentals=2 * B_pad * h_dim,
        bytes_accessed=(B_pad * x_dim * x_elt + w_bytes + b_bytes
                        + B_pad * out_pad * out_elt),
    )

    out = pl.pallas_call(
        _encoder_kernel,
        out_shape=jax.ShapeDtypeStruct((B_pad, out_pad), x.dtype),
        grid_spec=pltpu.PrefetchScalarGridSpec(
            num_scalar_prefetch=0,
            grid=grid,
            in_specs=[
                pl.BlockSpec((bb, x_dim), rowmap),     # x tile (native f32)
                w_spec((x_dim, h_dim)),                # w1 (bf16)
                w_spec((1, h_dim)),                    # b1 (f32)
                w_spec((h_dim, h_dim)),                # w2 (bf16)
                w_spec((1, h_dim)),                    # b2 (f32)
                w_spec((h_dim, out_pad)),              # w3 = [w31|w32|pad]
                w_spec((1, out_pad)),                  # b3 = [b31|b32|pad]
            ],
            out_specs=pl.BlockSpec((bb, out_pad), rowmap),
        ),
        compiler_params=pltpu.CompilerParams(
            dimension_semantics=("parallel",),
            vmem_limit_bytes=vmem_limit),
        cost_estimate=cost,
    )(x, prep["w1"], prep["b1"], prep["w2"], prep["b2"],
      prep["w3"], prep["b3"])

    # Thin slices of the packed output; inside this jit they stay cheap/lazy.
    mu = out[:B, :z_dim]
    lv = out[:B, z_dim:2 * z_dim]
    return mu, lv


def init_params(key, x_dim, z_dim, dtype=jnp.float32):
    """Deterministic synthetic parameters matching nn.Linear shapes.
    Stored already transposed: (in_features, out_features)."""
    h_dim = x_dim // 2
    ks = jax.random.split(key, 8)

    def lin(kw, kb, fan_in, fan_out):
        bound = 1.0 / jnp.sqrt(fan_in)
        w = jax.random.uniform(kw, (fan_in, fan_out), dtype, -bound, bound)
        b = jax.random.uniform(kb, (1, fan_out), dtype, -bound, bound)
        return w, b

    w1, b1 = lin(ks[0], ks[1], x_dim, h_dim)
    w2, b2 = lin(ks[2], ks[3], h_dim, h_dim)
    w31, b31 = lin(ks[4], ks[5], h_dim, z_dim)
    w32, b32 = lin(ks[6], ks[7], h_dim, z_dim)
    return dict(w1=w1, b1=b1, w2=w2, b2=b2,
                w31=w31, b31=b31, w32=w32, b32=b32)


def _reference(x, p):
    """Pure-JAX reference with matching dtypes (bf16 matmuls, f32 accumulate)."""
    cdt = jnp.bfloat16

    def lin(h, w, b):
        return (jnp.dot(h.astype(cdt), w.astype(cdt),
                        preferred_element_type=jnp.float32)
                + b.astype(jnp.float32))

    silu = lambda v: v * jax.nn.sigmoid(v)
    h = silu(lin(x, p["w1"], p["b1"]))
    h = silu(lin(h, p["w2"], p["b2"]))
    mu = lin(h, p["w31"], p["b31"]).astype(x.dtype)
    lv = lin(h, p["w32"], p["b32"]).astype(x.dtype)
    return mu, lv


if __name__ == "__main__":
    key = jax.random.PRNGKey(0)
    k_x, k_x2, k_p = jax.random.split(key, 3)

    X_DIM, Z_DIM = 256, 32                 # hidden = x_dim // 2 = 128
    params = init_params(k_p, X_DIM, Z_DIM)
    prep, z_dim = prepare_params(params)   # one-time: fuse + pad + bf16 cast
    jax.block_until_ready(prep)

    # Aligned batch: 2 grid steps at bb=128 (feeds both v7x TCs; 2 cheap
    # serial steps on v5e/v6e).
    B = 256
    x = jax.random.normal(k_x, (B, X_DIM), jnp.float32)
    mu, lv = abundance_encoder(x, prep, z_dim=z_dim)
    jax.block_until_ready((mu, lv))
    mu_ref, lv_ref = _reference(x, params)
    assert mu.shape == (B, Z_DIM) and lv.shape == (B, Z_DIM)
    assert jnp.allclose(mu, mu_ref, atol=5e-3, rtol=5e-3)
    assert jnp.allclose(lv, lv_ref, atol=5e-3, rtol=5e-3)

    # Ragged batch: exercises the zero-padding path (pads 100 -> 128 rows).
    B2 = 100
    x2 = jax.random.normal(k_x2, (B2, X_DIM), jnp.float32)
    mu2, lv2 = abundance_encoder(x2, prep, z_dim=z_dim)
    jax.block_until_ready((mu2, lv2))
    mu2_ref, lv2_ref = _reference(x2, params)
    assert mu2.shape == (B2, Z_DIM) and lv2.shape == (B2, Z_DIM)
    assert jnp.allclose(mu2, mu2_ref, atol=5e-3, rtol=5e-3)
    assert jnp.allclose(lv2, lv2_ref, atol=5e-3, rtol=5e-3)

    print("KERNEL_OK")
</pallas_src>

<mosaic_0001>
module attributes {stable_mosaic.version = 11 : i64} {
  func.func @_encoder_kernel(%arg0: i32, %arg1: memref<128x256xf32, #tpu.memory_space<vmem>>, %arg2: memref<256x128xbf16, #tpu.memory_space<vmem>>, %arg3: memref<1x128xf32, #tpu.memory_space<vmem>>, %arg4: memref<128x128xbf16, #tpu.memory_space<vmem>>, %arg5: memref<1x128xf32, #tpu.memory_space<vmem>>, %arg6: memref<128x128xbf16, #tpu.memory_space<vmem>>, %arg7: memref<1x128xf32, #tpu.memory_space<vmem>>, %arg8: memref<128x128xf32, #tpu.memory_space<vmem>>) attributes {dimension_semantics = [#tpu.dimension_semantics<parallel>], iteration_bounds = array<i64: 2>, scalar_prefetch = 0 : i64, scratch_operands = 0 : i64, tpu.core_type = #tpu.core_type<tc>, window_params = [{transform_indices = @transform_0, window_bounds = array<i64: 128, 256>}, {pipeline_mode = #tpu.pipeline_mode<synchronous>, transform_indices = @transform_1, window_bounds = array<i64: 256, 128>}, {pipeline_mode = #tpu.pipeline_mode<synchronous>, transform_indices = @transform_2, window_bounds = array<i64: 1, 128>}, {pipeline_mode = #tpu.pipeline_mode<synchronous>, transform_indices = @transform_3, window_bounds = array<i64: 128, 128>}, {pipeline_mode = #tpu.pipeline_mode<synchronous>, transform_indices = @transform_4, window_bounds = array<i64: 1, 128>}, {pipeline_mode = #tpu.pipeline_mode<synchronous>, transform_indices = @transform_5, window_bounds = array<i64: 128, 128>}, {pipeline_mode = #tpu.pipeline_mode<synchronous>, transform_indices = @transform_6, window_bounds = array<i64: 1, 128>}, {transform_indices = @transform_7, window_bounds = array<i64: 128, 128>}]} {
    %c0 = arith.constant 0 : index
    %c0_0 = arith.constant 0 : index
    %0 = vector.load %arg1[%c0, %c0_0] : memref<128x256xf32, #tpu.memory_space<vmem>>, vector<128x256xf32>
    %1 = arith.truncf %0 : vector<128x256xf32> to vector<128x256xbf16>
    %c0_1 = arith.constant 0 : index
    %c0_2 = arith.constant 0 : index
    %2 = vector.load %arg2[%c0_1, %c0_2] : memref<256x128xbf16, #tpu.memory_space<vmem>>, vector<256x128xbf16>
    %cst = arith.constant dense<0.000000e+00> : vector<128x128xf32>
    %3 = tpu.matmul %1, %2, %cst {dimension_numbers = #tpu.dot_dimension_numbers<[1], [0], [0], [1], [0, 0, 1, 1], [], []>} : vector<128x256xbf16>, vector<256x128xbf16>, vector<128x128xf32> -> vector<128x128xf32>
    %c0_3 = arith.constant 0 : index
    %c0_4 = arith.constant 0 : index
    %4 = vector.load %arg3[%c0_3, %c0_4] : memref<1x128xf32, #tpu.memory_space<vmem>>, vector<1x128xf32>
    %5 = vector.broadcast %4 : vector<1x128xf32> to vector<128x128xf32>
    %6 = arith.addf %3, %5 : vector<128x128xf32>
    %7 = arith.negf %6 : vector<128x128xf32>
    %8 = math.exp %7 : vector<128x128xf32>
    %cst_5 = arith.constant 1.000000e+00 : f32
    %9 = vector.broadcast %cst_5 : f32 to vector<128x128xf32>
    %10 = arith.addf %9, %8 : vector<128x128xf32>
    %11 = arith.divf %9, %10 : vector<128x128xf32>
    %12 = arith.mulf %6, %11 : vector<128x128xf32>
    %13 = arith.truncf %12 : vector<128x128xf32> to vector<128x128xbf16>
    %c0_6 = arith.constant 0 : index
    %c0_7 = arith.constant 0 : index
    %14 = vector.load %arg4[%c0_6, %c0_7] : memref<128x128xbf16, #tpu.memory_space<vmem>>, vector<128x128xbf16>
    %cst_8 = arith.constant dense<0.000000e+00> : vector<128x128xf32>
    %15 = tpu.matmul %13, %14, %cst_8 {dimension_numbers = #tpu.dot_dimension_numbers<[1], [0], [0], [1], [0, 0, 1, 1], [], []>} : vector<128x128xbf16>, vector<128x128xbf16>, vector<128x128xf32> -> vector<128x128xf32>
    %c0_9 = arith.constant 0 : index
    %c0_10 = arith.constant 0 : index
    %16 = vector.load %arg5[%c0_9, %c0_10] : memref<1x128xf32, #tpu.memory_space<vmem>>, vector<1x128xf32>
    %17 = vector.broadcast %16 : vector<1x128xf32> to vector<128x128xf32>
    %18 = arith.addf %15, %17 : vector<128x128xf32>
    %19 = arith.negf %18 : vector<128x128xf32>
    %20 = math.exp %19 : vector<128x128xf32>
    %cst_11 = arith.constant 1.000000e+00 : f32
    %21 = vector.broadcast %cst_11 : f32 to vector<128x128xf32>
    %22 = arith.addf %21, %20 : vector<128x128xf32>
    %23 = arith.divf %21, %22 : vector<128x128xf32>
    %24 = arith.mulf %18, %23 : vector<128x128xf32>
    %25 = arith.truncf %24 : vector<128x128xf32> to vector<128x128xbf16>
    %c0_12 = arith.constant 0 : index
    %c0_13 = arith.constant 0 : index
    %26 = vector.load %arg6[%c0_12, %c0_13] : memref<128x128xbf16, #tpu.memory_space<vmem>>, vector<128x128xbf16>
    %cst_14 = arith.constant dense<0.000000e+00> : vector<128x128xf32>
    %27 = tpu.matmul %25, %26, %cst_14 {dimension_numbers = #tpu.dot_dimension_numbers<[1], [0], [0], [1], [0, 0, 1, 1], [], []>} : vector<128x128xbf16>, vector<128x128xbf16>, vector<128x128xf32> -> vector<128x128xf32>
    %c0_15 = arith.constant 0 : index
    %c0_16 = arith.constant 0 : index
    %28 = vector.load %arg7[%c0_15, %c0_16] : memref<1x128xf32, #tpu.memory_space<vmem>>, vector<1x128xf32>
    %29 = vector.broadcast %28 : vector<1x128xf32> to vector<128x128xf32>
    %30 = arith.addf %27, %29 : vector<128x128xf32>
    %c0_17 = arith.constant 0 : index
    %c0_18 = arith.constant 0 : index
    %31 = vector.load %arg8[%c0_17, %c0_18] : memref<128x128xf32, #tpu.memory_space<vmem>>, vector<128x128xf32>
    tpu.vector_store %arg8[%c0_17, %c0_18], %30 {strides = array<i32>} : memref<128x128xf32, #tpu.memory_space<vmem>>, vector<128x128xf32>,
    return
  }
  func.func @transform_0(%arg0: i32) -> (i32, i32) {
    %c0_i32 = arith.constant 0 : i32
    %c0_i32_0 = arith.constant 0 : i32
    return %arg0, %c0_i32 : i32, i32
  }
  func.func @transform_1(%arg0: i32) -> (i32, i32) {
    %c0_i32 = arith.constant 0 : i32
    %c0_i32_0 = arith.constant 0 : i32
    %c0_i32_1 = arith.constant 0 : i32
    return %c0_i32, %c0_i32_0 : i32, i32
  }
  func.func @transform_2(%arg0: i32) -> (i32, i32) {
    %c0_i32 = arith.constant 0 : i32
    %c0_i32_0 = arith.constant 0 : i32
    %c0_i32_1 = arith.constant 0 : i32
    return %c0_i32, %c0_i32_0 : i32, i32
  }
  func.func @transform_3(%arg0: i32) -> (i32, i32) {
    %c0_i32 = arith.constant 0 : i32
    %c0_i32_0 = arith.constant 0 : i32
    %c0_i32_1 = arith.constant 0 : i32
    return %c0_i32, %c0_i32_0 : i32, i32
  }
  func.func @transform_4(%arg0: i32) -> (i32, i32) {
    %c0_i32 = arith.constant 0 : i32
    %c0_i32_0 = arith.constant 0 : i32
    %c0_i32_1 = arith.constant 0 : i32
    return %c0_i32, %c0_i32_0 : i32, i32
  }
  func.func @transform_5(%arg0: i32) -> (i32, i32) {
    %c0_i32 = arith.constant 0 : i32
    %c0_i32_0 = arith.constant 0 : i32
    %c0_i32_1 = arith.constant 0 : i32
    return %c0_i32, %c0_i32_0 : i32, i32
  }
  func.func @transform_6(%arg0: i32) -> (i32, i32) {
    %c0_i32 = arith.constant 0 : i32
    %c0_i32_0 = arith.constant 0 : i32
    %c0_i32_1 = arith.constant 0 : i32
    return %c0_i32, %c0_i32_0 : i32, i32
  }
  func.func @transform_7(%arg0: i32) -> (i32, i32) {
    %c0_i32 = arith.constant 0 : i32
    %c0_i32_0 = arith.constant 0 : i32
    return %arg0, %c0_i32 : i32, i32
  }
}

</mosaic_0001>

<bundles_post_ra>
// kernel: abundance_encoder.1
= control target key start
LH: loop header
LB: loop body
LE: loop exit
PB: predicated region body
PF: predicated region fallthrough
CT: control target
= control target key end

     0   :  { %12 = vsyncpa [#allocation3], 0  ;;  %s2376_s0 = inlined_call_operand.hbm [shape: f32[256,256], index: 0, kind: input, shape index: {}]   ;;  %s2377_s1 = inlined_call_operand.hbm [shape: bf16[256,128], index: 1, kind: input, shape index: {}]   ;;  %s2378_s2 = inlined_call_operand.vmem [shape: f32[1,128], index: 2, kind: input, shape index: {}]   ;;  %s2379_s3 = inlined_call_operand.hbm [shape: bf16[128,128], index: 3, kind: input, shape index: {}]   ;;  %s2380_s4 = inlined_call_operand.vmem [shape: f32[1,128], index: 4, kind: input, shape index: {}]   ;;  %s2381_s5 = inlined_call_operand.hbm [shape: bf16[128,128], index: 5, kind: input, shape index: {}]   ;;  %s2382_s6 = inlined_call_operand.vmem [shape: f32[1,128], index: 6, kind: input, shape index: {}]   ;;  %s2383_s7 = inlined_call_operand.vmem [shape: f32[256,128], index: 7, kind: output, shape index: {}]  }
   0x1   :  { %14 = vsyncpa [#allocation3 + $0x1], 0 }
   0x2   :  { %15 = vsyncpa [#allocation5], 0 }
   0x3   :  { %16 = vsyncpa [#allocation8], 0  ;;  %s2004_s24 = smov 0   ;;  %s2006_s25 = smov 0  }
   0x4   :  { %s2008_s26 = smov 0   ;;  %s2010_s27 = smov 0  }
   0x5 LB: > { %s1315_s28 = sadd.s32 4294967295, %s1954_s27   ;;  %p42_p0 = scmp.ne.s32.totalorder %s1946_s25, %s1942_s24  ;;  %s1954_s27 = sphi %s2010_s27, %s2400_s27   ;;  %s1950_s26 = sphi %s2008_s26, %s2399_s26   ;;  %s1946_s25 = sphi %s2006_s25, %s2398_s25   ;;  %s1942_s24 = sphi %s2004_s24, %s2397_s24  }
   0x6   : > { %p2026_p1 = scmp.eq.s32.totalorder %s1315_s28, 0  ;;  %p1317_p2 = scmp.ge.s32.totalorder %s1954_s27, 1 }
   0x7   : > { %p205_p3 = scmp.lt.s32.totalorder %s1954_s27, 3  ;;  %s1956_s9 = smov [#allocation4]  }
   0x8   : > { %s2388_s29 = scalar_select %p2026_p1, 1, 0 }
   0x9   : > { %p2034_p4 = por %p2026_p1, %p42_p0  ;;  %p2038_p5 = pnand %p1317_p2, %p205_p3 }
   0xa   : > { %s217_s10 = sshll.u32 %s1956_s9, 4  ;;  %s1957_s12 = smov [#allocation6]   ;;  %s2042_s10 = int_to_ptr.vmem [resolvable:$true] %s217_s10 }
   0xb   : > { %s2389_s30 = scalar_select %p2034_p4, 1, 0 }
   0xc   : > { %s2390_s8 = scalar_select %p2038_p5, 1, 0 }
   0xd   : > { %p1578_p6 = pneg %p2038_p5  ;;  %s233_s13 = sshll.u32 %s1957_s12, 4  ;;  %s2052_s13 = int_to_ptr.vmem [resolvable:$true] %s233_s13 }
   0xe   : > { %s1958_s14 = smov [#allocation7]   ;;  %s1798_s18 = scalar_lea.hbm %s2377_s1, 2048 }
   0xf   : > { %p2048_p7 = pnand %p1578_p6, %p2026_p1  ;;  %s2054_s15 = sshll.u32 %s1958_s14, 4  ;;  %s250_s15 = int_to_ptr.vmem [resolvable:$true] %s2054_s15 }
  0x10   : > { %p1799_p8 = scmp.ne.s32.totalorder %s2377_s1, %s1798_s18  ;;  %p1805_p12 = scmp.lt.u32.totalorder %s1798_s18, %s2377_s1 }
  0x11   : > { %p2064_p9 = pneg %p2048_p7 }
  0x13   : > { %p1801_p10 = pnand %p2064_p9, %p1799_p8 }
  0x15   : > { %p1802_p11 = pneg %p1801_p10 }
  0x17   : > { %p1807_p13 = pnand %p1805_p12, %p1802_p11 }
  0x19   : > { %1810 = shalt.err (!%p1807_p13)
}
  0x1a   : > { %s1811_s24 = scalar_lea.vmem %s2042_s10, 2048  ;;  %p1819_p6 = scmp.lt.s32.totalorder %s2042_s10, %s2042_s10 }
  0x1b   : > { %p1812_p0 = scmp.ne.s32.totalorder %s2042_s10, %s1811_s24  ;;  %p1820_p1 = scmp.lt.s32.totalorder %s1811_s24, %s1811_s24 }
  0x1d   : > { %p1814_p2 = pnand %p1812_p0, %p2064_p9  ;;  %p1821_p8 = por %p1820_p1, %p1819_p6 }
  0x1f   : > { %p1815_p3 = pneg %p1814_p2 }
  0x21   : > { %p1822_p10 = pnand %p1821_p8, %p1815_p3 }
  0x23   : > { %1825 = shalt.err (!%p1822_p10)
}
  0x24   : > { %s1959_s9 = smov 64   ;;  %s1960_s12 = smov 4  }
  0x25   : > { %1581 = dma.hbm_to_vmem [thread:$0]  (!%p2048_p7), %s2377_s1, 2048, %s2042_s10, [#allocation5], %s1959_s9, %s1959_s9, %s1960_s12  }
  0x26   : > { %s1826_s19 = scalar_lea.hbm %s2379_s3, 1024 }
  0x27   : > { %p1827_p1 = scmp.ne.s32.totalorder %s2379_s3, %s1826_s19  ;;  %p1833_p13 = scmp.lt.u32.totalorder %s1826_s19, %s2379_s3 }
  0x29   : > { %p1829_p11 = pnand %p1827_p1, %p2064_p9 }
  0x2b   : > { %p1830_p12 = pneg %p1829_p11 }
  0x2d   : > { %p1835_p0 = pnand %p1833_p13, %p1830_p12 }
  0x2f   : > { %1838 = shalt.err (!%p1835_p0)
}
  0x30   : > { %s1839_s10 = scalar_lea.vmem %s2052_s13, 1024  ;;  %p1847_p8 = scmp.lt.s32.totalorder %s2052_s13, %s2052_s13 }
  0x31   : > { %p1840_p2 = scmp.ne.s32.totalorder %s2052_s13, %s1839_s10  ;;  %p1848_p10 = scmp.lt.s32.totalorder %s1839_s10, %s1839_s10 }
  0x33   : > { %p1842_p3 = pnand %p1840_p2, %p2064_p9  ;;  %p1849_p1 = por %p1848_p10, %p1847_p8 }
  0x35   : > { %p1843_p6 = pneg %p1842_p3 }
  0x37   : > { %p1850_p11 = pnand %p1849_p1, %p1843_p6 }
  0x39   : > { %1853 = shalt.err (!%p1850_p11)
}
  0x3a   : > { %1584 = dma.hbm_to_vmem [thread:$0]  (!%p2048_p7), %s2379_s3, 1024, %s2052_s13, [#allocation5], %s1959_s9, %s1959_s9, %s1960_s12  }
  0x3b   : > { %s1854_s19 = scalar_lea.hbm %s2381_s5, 1024 }
  0x3c   : > { %p1855_p12 = scmp.ne.s32.totalorder %s2381_s5, %s1854_s19  ;;  %p1861_p2 = scmp.lt.u32.totalorder %s1854_s19, %s2381_s5 }
  0x3e   : > { %p1857_p13 = pnand %p1855_p12, %p2064_p9 }
  0x40   : > { %p1858_p0 = pneg %p1857_p13 }
  0x42   : > { %p1863_p3 = pnand %p1861_p2, %p1858_p0 }
  0x44   : > { %1866 = shalt.err (!%p1863_p3)
}
  0x45   : > { %s1867_s10 = scalar_lea.vmem %s250_s15, 1024  ;;  %p1875_p1 = scmp.lt.s32.totalorder %s250_s15, %s250_s15 }
  0x46   : > { %p1868_p6 = scmp.ne.s32.totalorder %s250_s15, %s1867_s10  ;;  %p1876_p11 = scmp.lt.s32.totalorder %s1867_s10, %s1867_s10 }
  0x48   : > { %p1870_p8 = pnand %p1868_p6, %p2064_p9  ;;  %p1877_p4 = por %p1876_p11, %p1875_p1 }
  0x4a   : > { %p1871_p10 = pneg %p1870_p8 }
  0x4c   : > { %p1878_p5 = pnand %p1877_p4, %p1871_p10 }
  0x4e   : > { %1881 = shalt.err (!%p1878_p5)
}
  0x4f   : > { %1587 = dma.hbm_to_vmem [thread:$0]  (!%p2048_p7), %s2381_s5, 1024, %s250_s15, [#allocation8], %s1959_s9, %s1959_s9, %s1960_s12  }
  0x50   : > { %s2137_s21 = sadd.s32 1, %s1954_s27   ;;  %s29_s16 = sadd.s32 1, %s1950_s26 }
  0x51   : > { %s26_s11 = ssub.s32 %s1954_s27, %s2137_s21  ;;  %p36_p5 = scmp.ne.s32.totalorder %s1950_s26, %s1946_s25 }
  0x52   : > { %p27_p4 = scmp.eq.s32.totalorder %s26_s11, 0  ;;  %p37_p9 = scmp.eq.s32.totalorder %s1954_s27, 0 }
  0x53   : > { %p1595_p12 = scmp.lt.s32.totalorder %s1954_s27, 2  ;;  %s266_s18 = sand.u32 1, %s1950_s26  }
  0x54   : > { %s2147_s17 = scalar_select %p27_p4, %s1950_s26, %s29_s16  }
  0x55   : > { %p38_p13 = por %p37_p9, %p36_p5  ;;  %s1322_s19 = sshll.u32 %s266_s18, 8 }
  0x56   : > { %s1403_s20 = sshll.u32 %s1954_s27, 12  ;;  %s270_s15 = scalar_lea.vmem [#allocation2], %s1322_s19 }
  0x57   : > { %s2154_s24 = scalar_lea.hbm %s2376_s0, %s1403_s20  ;;  %s278_s9 = sshll.u32 %s270_s15, 4  ;;  %s2156_s9 = int_to_ptr.vmem [resolvable:$true] %s278_s9 }
  0x58   : > { %p2158_p7 = pnand %p1595_p12, %p38_p13  ;;  %s2162_s10 = scalar_lea.sflag [#allocation3], %s266_s18 }
  0x59   : > { %s1882_s13 = scalar_lea.hbm %s2154_s24, 4096  ;;  %s1887_s16 = scalar_lea.hbm %s2376_s0, 8192 }
  0x5a   : > { %p1883_p0 = scmp.ne.s32.totalorder %s2154_s24, %s1882_s13  ;;  %p1884_p2 = pneg %p2158_p7 }
  0x5b   : > { %p1888_p8 = scmp.lt.u32.totalorder %s2154_s24, %s2376_s0  ;;  %p1889_p10 = scmp.lt.u32.totalorder %s1887_s16, %s1882_s13 }
  0x5c   : > { %p1885_p3 = pnand %p1884_p2, %p1883_p0  ;;  %p1891_p11 = scmp.lt.u32.totalorder %s1882_s13, %s2154_s24 }
  0x5d   : > { %p1890_p1 = por %p1889_p10, %p1888_p8 }
  0x5e   : > { %p1886_p6 = pneg %p1885_p3 }
  0x5f   : > { %p1892_p4 = por %p1891_p11, %p1890_p1 }
  0x61   : > { %p1893_p5 = pnand %p1892_p4, %p1886_p6 }
  0x63   : > { %1896 = shalt.err (!%p1893_p5)
}
  0x64   : > { %s1897_s18 = scalar_lea.vmem %s2156_s9, 4096  ;;  %s1961_s22 = smov [#allocation2]  }
  0x65   : > { %p1898_p9 = scmp.ne.s32.totalorder %s2156_s9, %s1897_s18  ;;  %s1902_s23 = sshll.u32 %s1961_s22, 4  ;;  %s1903_s23 = int_to_ptr.vmem [resolvable:$false] %s1902_s23 }
  0x66   : > { %s1904_s15 = scalar_lea.vmem %s1903_s23, 8192  ;;  %p1905_p0 = scmp.lt.s32.totalorder %s2156_s9, %s1903_s23 }
  0x67   : > { %p1900_p12 = pnand %p1898_p9, %p1884_p2  ;;  %p1906_p3 = scmp.lt.s32.totalorder %s1904_s15, %s1897_s18 }
  0x69   : > { %p1901_p13 = pneg %p1900_p12  ;;  %p1907_p8 = por %p1906_p3, %p1905_p0 }
  0x6b   : > { %p1908_p10 = pnand %p1907_p8, %p1901_p13 }
  0x6d   : > { %1911 = shalt.err (!%p1908_p10)
}
  0x6e   : > { %s1962_s13 = smov 256   ;;  %s1963_s14 = smov 16  }
  0x6f   : > { %1591 = dma.hbm_to_vmem [thread:$0]  (!%p2158_p7), %s2154_s24, 4096, %s2156_s9, %s2162_s10, %s1962_s13, %s1962_s13, %s1963_s14  }
  0x70   : > { %p2394_p2 = scmp.ne.s32.totalorder %s2390_s8, 0 }
  0x71   : > { %s292_s11 = sand.u32 (!%p2394_p2), 1, %s1946_s25   ;;  %p2395_p6 = scmp.ne.s32.totalorder (!%p2394_p2), %s2389_s30, 0 }
  0x72   : > { %290 = sbr.rel (%p2394_p2) target bundleno = 934 (0x3a6), region = 48  ;;  %s1327_s16 = sshll.u32 (!%p2394_p2), %s292_s11, 8 }
  0x73   : > { %s293_s19 = scalar_lea.sflag (!%p2394_p2), [#allocation3], %s292_s11  ;;  %s2193_s20 = scalar_lea.vmem (!%p2394_p2), [#allocation2], %s1327_s16 }
  0x79   : > { %1929 = dma.done.wait (%p2395_p6), %s293_s19, 4096  }
  0x7a   : > { %1931 = vsyncadd (%p2395_p6), %s293_s19, 4294963200  ;;  %p2396_p1 = scmp.ne.s32.totalorder %s2388_s29, 0 }
  0x7c   : > { %1933 = dma.done.wait (%p2396_p1), [#allocation5], 3072  }
  0x7d   : > { %1935 = vsyncadd (%p2396_p1), [#allocation5], 4294964224 }
  0x7e   : > { %1937 = dma.done.wait (%p2396_p1), [#allocation8], 1024  }
  0x7f   : > { %1939 = vsyncadd (%p2396_p1), [#allocation8], 4294966272  ;;  %v1638_v0 = vld [vmem:[#allocation4 + $0x40] sm:$0xff]   ;;  %v1640_v2 = vld [vmem:[#allocation4 + $0x48] sm:$0xff]   ;;  %s1331_s9 = sshll.u32 %s1315_s28, 4 }
  0x80   : > { %v1639_v1 = vld [vmem:[#allocation4] sm:$0xff]   ;;  %1404 = vmatprep.subr.bf16.mxu0 %v1638_v0  ;;  %v1641_v3 = vld [vmem:[#allocation4 + $0x8] sm:$0xff]   ;;  %v1642_v4 = vld [vmem:[#allocation4 + $0x50] sm:$0xff]   ;;  %p341_p7 = scmp.lt.s32.totalorder %s1331_s9, 31 }
  0x81   : > { %1405 = vmatpush3.bf16.msra.mxu0 %v1639_v1  ;;  %v1643_v5 = vld [vmem:[#allocation4 + $0x10] sm:$0xff]   ;;  %v1644_v6 = vld [vmem:[#allocation4 + $0x58] sm:$0xff]   ;;  %v1646_v8 = vld [vmem:[#allocation4 + $0x60] sm:$0xff]  }
  0x82   : > { %1406 = vmatprep.subr.bf16.mxu0 %v1640_v2  ;;  %v1645_v7 = vld [vmem:[#allocation4 + $0x18] sm:$0xff]   ;;  %v1647_v9 = vld [vmem:[#allocation4 + $0x20] sm:$0xff]   ;;  %v1648_v10 = vld [vmem:[#allocation4 + $0x68] sm:$0xff]   ;;  %s2402_s9 = smov (!%p341_p7, %s1331_s9), 31 }
  0x83   : > { %v348_v11 = vld [vmem:[%s2193_s20 + $0x8] sm:$0xff]  ;;  %v350_v12 = vld [vmem:[%s2193_s20 + $0x18] sm:$0xff]  ;;  %v1650_v15 = vld [vmem:[#allocation4 + $0x70] sm:$0xff]   ;;  %s1332_s12 = sshll.u32 %s2402_s9, 3 }
  0x84   : > { %v380_v13 = vpack.c.bf16 %v350_v12, %v348_v11  ;;  %v1649_v14 = vld [vmem:[#allocation4 + $0x28] sm:$0xff]   ;;  %v1651_v16 = vld [vmem:[#allocation4 + $0x30] sm:$0xff]   ;;  %v1652_v17 = vld [vmem:[#allocation4 + $0x78] sm:$0xff]   ;;  %s2345_s15 = scalar_lea.vmem %s2383_s7, %s1332_s12 }
  0x85   : > { %1407 = vmatpush3.bf16.msra.mxu0 %v1641_v3  ;;  %v1653_v18 = vld [vmem:[#allocation4 + $0x38] sm:$0xff]   ;;  %v347_v19 = vld [vmem:[%s2193_s20] sm:$0xff]  ;;  %v349_v20 = vld [vmem:[%s2193_s20 + $0x10] sm:$0xff] }
  0x86   : > { %1408 = vmatprep.subr.bf16.mxu0 %v1642_v4  ;;  %562 = vmatprep.mubr.bf16.mxu0 %v380_v13  ;;  %v352_v21 = vld [vmem:[%s2193_s20 + $0x28] sm:$0xff]  ;;  %v354_v22 = vld [vmem:[%s2193_s20 + $0x38] sm:$0xff]  ;;  %v379_v23 = vpack.c.bf16 %v349_v20, %v347_v19  ;;  %v351_v25 = vld [vmem:[%s2193_s20 + $0x20] sm:$0xff] }
  0x87   : > { %v382_v24 = vpack.c.bf16 %v354_v22, %v352_v21  ;;  %v353_v26 = vld [vmem:[%s2193_s20 + $0x30] sm:$0xff]  ;;  %v356_v27 = vld [vmem:[%s2193_s20 + $0x48] sm:$0xff]  ;;  %v358_v28 = vld [vmem:[%s2193_s20 + $0x58] sm:$0xff] }
  0x88   : > { %v381_v29 = vpack.c.bf16 %v353_v26, %v351_v25  ;;  %v384_v30 = vpack.c.bf16 %v358_v28, %v356_v27  ;;  %v355_v31 = vld [vmem:[%s2193_s20 + $0x40] sm:$0xff]  ;;  %v357_v32 = vld [vmem:[%s2193_s20 + $0x50] sm:$0xff]  ;;  %v360_v33 = vld [vmem:[%s2193_s20 + $0x68] sm:$0xff] }
  0x89   : > { %1409 = vmatpush3.bf16.msra.mxu0 %v1643_v5  ;;  %v362_v34 = vld [vmem:[%s2193_s20 + $0x78] sm:$0xff]  ;;  %v383_v35 = vpack.c.bf16 %v357_v32, %v355_v31  ;;  %v359_v37 = vld [vmem:[%s2193_s20 + $0x60] sm:$0xff]  ;;  %v361_v38 = vld [vmem:[%s2193_s20 + $0x70] sm:$0xff] }
  0x8a   : > { %1410 = vmatprep.subr.bf16.mxu0 %v1644_v6  ;;  %v386_v36 = vpack.c.bf16 %v362_v34, %v360_v33  ;;  %v364_v39 = vld [vmem:[%s2193_s20 + $0x88] sm:$0xff]  ;;  %v366_v40 = vld [vmem:[%s2193_s20 + $0x98] sm:$0xff]  ;;  %v385_v41 = vpack.c.bf16 %v361_v38, %v359_v37  ;;  %v363_v43 = vld [vmem:[%s2193_s20 + $0x80] sm:$0xff] }
  0x8b   : > { %v388_v42 = vpack.c.bf16 %v366_v40, %v364_v39  ;;  %v365_v44 = vld [vmem:[%s2193_s20 + $0x90] sm:$0xff]  ;;  %v368_v45 = vld [vmem:[%s2193_s20 + $0xa8] sm:$0xff]  ;;  %v370_v46 = vld [vmem:[%s2193_s20 + $0xb8] sm:$0xff] }
  0x8c   : > { %v387_v47 = vpack.c.bf16 %v365_v44, %v363_v43  ;;  %v390_v48 = vpack.c.bf16 %v370_v46, %v368_v45  ;;  %v367_v49 = vld [vmem:[%s2193_s20 + $0xa0] sm:$0xff]  ;;  %v369_v50 = vld [vmem:[%s2193_s20 + $0xb0] sm:$0xff]  ;;  %v372_v51 = vld [vmem:[%s2193_s20 + $0xc8] sm:$0xff] }
  0x8d   : > { %1411 = vmatpush3.bf16.msra.mxu0 %v1645_v7  ;;  %v374_v52 = vld [vmem:[%s2193_s20 + $0xd8] sm:$0xff]  ;;  %v389_v53 = vpack.c.bf16 %v369_v50, %v367_v49  ;;  %v371_v55 = vld [vmem:[%s2193_s20 + $0xc0] sm:$0xff]  ;;  %v373_v56 = vld [vmem:[%s2193_s20 + $0xd0] sm:$0xff] }
  0x8e   : > { %1412 = vmatprep.subr.bf16.mxu0 %v1646_v8  ;;  %v392_v54 = vpack.c.bf16 %v374_v52, %v372_v51  ;;  %v376_v57 = vld [vmem:[%s2193_s20 + $0xe8] sm:$0xff]  ;;  %v378_v58 = vld [vmem:[%s2193_s20 + $0xf8] sm:$0xff]  ;;  %v391_v59 = vpack.c.bf16 %v373_v56, %v371_v55  ;;  %v375_v61 = vld [vmem:[%s2193_s20 + $0xe0] sm:$0xff] }
  0x8f   : > { %v394_v60 = vpack.c.bf16 %v378_v58, %v376_v57  ;;  %v377_v62 = vld [vmem:[%s2193_s20 + $0xf0] sm:$0xff]  ;;  %v1654_v0 = vld [vmem:[#allocation6] sm:$0xff]   ;;  %v1655_v1 = vld [vmem:[#allocation6 + $0x8] sm:$0xff]  }
  0x90   : > { %v393_v63 = vpack.c.bf16 %v377_v62, %v375_v61  ;;  %1500 = vmatprep.subr.bf16.mxu1 %v1654_v0  ;;  %v1656_v2 = vld [vmem:[#allocation6 + $0x10] sm:$0xff]   ;;  %v1657_v3 = vld [vmem:[#allocation6 + $0x18] sm:$0xff]   ;;  %v1658_v4 = vld [vmem:[#allocation6 + $0x20] sm:$0xff]  }
  0x91   : > { %1413 = vmatpush3.bf16.msra.mxu0 %v1647_v9  ;;  %1501 = vmatpush3.bf16.msra.mxu1 %v1654_v0  ;;  %v1659_v5 = vld [vmem:[#allocation6 + $0x28] sm:$0xff]   ;;  %v1660_v6 = vld [vmem:[#allocation6 + $0x30] sm:$0xff]   ;;  %v1661_v7 = vld [vmem:[#allocation6 + $0x38] sm:$0xff]  }
  0x92   : > { %1414 = vmatprep.subr.bf16.mxu0 %v1648_v10  ;;  %1502 = vmatprep.subr.bf16.mxu1 %v1655_v1  ;;  %v2242_v9 = vld [vmem:[%s2378_s2] ss:$0 sm:$0xff] }
  0x95   : > { %1415 = vmatpush3.bf16.msra.mxu0 %v1649_v14  ;;  %1503 = vmatpush3.bf16.msra.mxu1 %v1655_v1 }
  0x96   : > { %1416 = vmatprep.subr.bf16.mxu0 %v1650_v15  ;;  %1504 = vmatprep.subr.bf16.mxu1 %v1656_v2 }
  0x99   : > { %1417 = vmatpush3.bf16.msra.mxu0 %v1651_v16  ;;  %1505 = vmatpush3.bf16.msra.mxu1 %v1656_v2 }
  0x9a   : > { %1418 = vmatprep.subr.bf16.mxu0 %v1652_v17  ;;  %1506 = vmatprep.subr.bf16.mxu1 %v1657_v3 }
  0x9d   : > { %1419 = vmatpush3.bf16.msra.mxu0 %v1653_v18  ;;  %1507 = vmatpush3.bf16.msra.mxu1 %v1657_v3 }
  0x9e   : > { %1508 = vmatprep.subr.bf16.mxu1 %v1658_v4 }
  0xa0   : > { %563 = vmatmul.mubr.bf16.vlgmr.msra.gmra.mrb[0].mxu0 %v379_v23 }
  0xa1   : > { %570 = vmatprep.mubr.bf16.mxu0 %v382_v24  ;;  %1509 = vmatpush3.bf16.msra.mxu1 %v1658_v4 }
  0xa2   : > { %1510 = vmatprep.subr.bf16.mxu1 %v1659_v5 }
  0xa5   : > { %1511 = vmatpush3.bf16.msra.mxu1 %v1659_v5 }
  0xa6   : > { %1512 = vmatprep.subr.bf16.mxu1 %v1660_v6 }
  0xa8   : > { %571 = vmatmul.mubr.bf16.gmra.mrb[4].mxu0 %v381_v29 }
  0xa9   : > { %578 = vmatprep.mubr.bf16.mxu0 %v384_v30  ;;  %1513 = vmatpush3.bf16.msra.mxu1 %v1660_v6 }
  0xaa   : > { %1514 = vmatprep.subr.bf16.mxu1 %v1661_v7 }
  0xad   : > { %1515 = vmatpush3.bf16.msra.mxu1 %v1661_v7 }
  0xb0   : > { %579 = vmatmul.mubr.bf16.gmra.mrb[8].mxu0 %v383_v35 }
  0xb1   : > { %586 = vmatprep.mubr.bf16.mxu0 %v386_v36 }
  0xb8   : > { %587 = vmatmul.mubr.bf16.gmra.mrb[12].mxu0 %v385_v41 }
  0xb9   : > { %594 = vmatprep.mubr.bf16.mxu0 %v388_v42 }
  0xc0   : > { %595 = vmatmul.mubr.bf16.gmra.mrb[16].mxu0 %v387_v47 }
  0xc1   : > { %602 = vmatprep.mubr.bf16.mxu0 %v390_v48 }
  0xc8   : > { %603 = vmatmul.mubr.bf16.gmra.mrb[20].mxu0 %v389_v53 }
  0xc9   : > { %610 = vmatprep.mubr.bf16.mxu0 %v392_v54 }
  0xd0   : > { %611 = vmatmul.mubr.bf16.gmra.mrb[24].mxu0 %v391_v59 }
  0xd1   : > { %618 = vmatprep.mubr.bf16.mxu0 %v394_v60 }
  0xd8   : > { %619 = vmatmul.mubr.bf16.gmra.mrb[28].mxu0 %v393_v63 }
 0x173   : > { %v1420_v8 = vpop.f32.mrb[0].mxu0 }
 0x174   : > { %v1421_v10 = vpop.f32.mrb[1].mxu0 }
 0x175   : > { %v1422_v11 = vadd.f32 %v1421_v10, %v1420_v8  ;;  %v1423_v12 = vpop.f32.mrb[2].mxu0 }
 0x176   : > { %v1424_v13 = vpop.f32.mrb[3].mxu0 }
 0x177   : > { %v565_v14 = vadd.f32 %v1422_v11, %v2242_v9  ;;  %v1425_v15 = vadd.f32 %v1424_v13, %v1423_v12 }
 0x179   : > { %v1350_v16 = vmul.f32 -1.442695, %v565_v14  ;;  %v568_v17 = vadd.f32 %v1425_v15, %v2242_v9 }
 0x17b   : > { %1670 = vpow2.f32 %v1350_v16  ;;  %v1351_v18 = vmul.f32 -1.442695, %v568_v17  ;;  %v1426_v19 = vpop.f32.mrb[4].mxu0 }
 0x17c   : > { %v1427_v20 = vpop.f32.mrb[5].mxu0 }
 0x17d   : > { %1672 = vpow2.f32 %v1351_v18  ;;  %v1428_v21 = vadd.f32 %v1427_v20, %v1426_v19  ;;  %v1429_v22 = vpop.f32.mrb[6].mxu0 }
 0x17e   : > { %v1430_v23 = vpop.f32.mrb[7].mxu0 }
 0x17f   : > { %v2247_v24 = vadd.f32 %v1428_v21, %v2242_v9  ;;  %v1431_v25 = vadd.f32 %v1430_v23, %v1429_v22 }
 0x181   : > { %v1352_v26 = vmul.f32 -1.442695, %v2247_v24  ;;  %v2251_v27 = vadd.f32 %v1431_v25, %v2242_v9 }
 0x183   : > { %1674 = vpow2.f32 %v1352_v26  ;;  %v1353_v28 = vmul.f32 -1.442695, %v2251_v27  ;;  %v1432_v29 = vpop.f32.mrb[8].mxu0 }
 0x184   : > { %v1433_v30 = vpop.f32.mrb[9].mxu0 }
 0x185   : > { %v1671_v31 = vpop.eup %1670  ;;  %1676 = vpow2.f32 %v1353_v28  ;;  %v1434_v32 = vadd.f32 %v1433_v30, %v1432_v29  ;;  %v1435_v33 = vpop.f32.mrb[10].mxu0 }
 0x186   : > { %v675_v34 = vadd.f32 1.0, %v1671_v31  ;;  %v1436_v35 = vpop.f32.mrb[11].mxu0 }
 0x187   : > { %v1673_v36 = vpop.eup %1672  ;;  %v2255_v37 = vadd.f32 %v1434_v32, %v2242_v9  ;;  %v1437_v38 = vadd.f32 %v1436_v35, %v1435_v33 }
 0x188   : > { %1678 = vrcp.f32 %v675_v34  ;;  %v676_v39 = vadd.f32 1.0, %v1673_v36 }
 0x189   : > { %v1354_v40 = vmul.f32 -1.442695, %v2255_v37  ;;  %v2259_v41 = vadd.f32 %v1437_v38, %v2242_v9 }
 0x18a   : > { %1680 = vrcp.f32 %v676_v39 }
 0x18b   : > { %1682 = vpow2.f32 %v1354_v40  ;;  %v1355_v42 = vmul.f32 -1.442695, %v2259_v41  ;;  %v1438_v43 = vpop.f32.mrb[12].mxu0 }
 0x18c   : > { %v1439_v44 = vpop.f32.mrb[13].mxu0 }
 0x18d   : > { %v1675_v45 = vpop.eup %1674  ;;  %1684 = vpow2.f32 %v1355_v42  ;;  %v1440_v46 = vadd.f32 %v1439_v44, %v1438_v43  ;;  %v1441_v47 = vpop.f32.mrb[14].mxu0 }
 0x18e   : > { %v677_v48 = vadd.f32 1.0, %v1675_v45  ;;  %v1442_v49 = vpop.f32.mrb[15].mxu0 }
 0x18f   : > { %v1677_v50 = vpop.eup %1676  ;;  %v2263_v51 = vadd.f32 %v1440_v46, %v2242_v9  ;;  %v1443_v52 = vadd.f32 %v1442_v49, %v1441_v47 }
 0x190   : > { %1686 = vrcp.f32 %v677_v48  ;;  %v678_v53 = vadd.f32 1.0, %v1677_v50 }
 0x191   : > { %v1356_v54 = vmul.f32 -1.442695, %v2263_v51  ;;  %v2267_v55 = vadd.f32 %v1443_v52, %v2242_v9 }
 0x192   : > { %v1679_v56 = vpop.eup %1678  ;;  %1688 = vrcp.f32 %v678_v53 }
 0x193   : > { %1690 = vpow2.f32 %v1356_v54  ;;  %v1357_v57 = vmul.f32 -1.442695, %v2267_v55  ;;  %v1444_v58 = vpop.f32.mrb[16].mxu0  ;;  %v723_v0 = vmul.f32 %v1679_v56, %v565_v14 }
 0x194   : > { %v1681_v59 = vpop.eup %1680  ;;  %v1445_v60 = vpop.f32.mrb[17].mxu0 }
 0x195   : > { %v1683_v61 = vpop.eup %1682  ;;  %1692 = vpow2.f32 %v1357_v57  ;;  %v1446_v62 = vadd.f32 %v1445_v60, %v1444_v58  ;;  %v1447_v63 = vpop.f32.mrb[18].mxu0  ;;  %v724_v1 = vmul.f32 %v1681_v59, %v568_v17 }
 0x196   : > { %v679_v2 = vadd.f32 1.0, %v1683_v61  ;;  %v1448_v3 = vpop.f32.mrb[19].mxu0 }
 0x197   : > { %v1685_v4 = vpop.eup %1684  ;;  %v2271_v5 = vadd.f32 %v1446_v62, %v2242_v9  ;;  %v1449_v6 = vadd.f32 %v1448_v3, %v1447_v63  ;;  %v739_v7 = vpack.c.bf16 %v724_v1, %v723_v0 }
 0x198   : > { %1694 = vrcp.f32 %v679_v2  ;;  %v680_v8 = vadd.f32 1.0, %v1685_v4 }
 0x199   : > { %v1358_v10 = vmul.f32 -1.442695, %v2271_v5  ;;  %v2275_v11 = vadd.f32 %v1449_v6, %v2242_v9  ;;  %1516 = vmatprep.mubr.bf16.mxu1 %v739_v7 }
 0x19a   : > { %v1687_v12 = vpop.eup %1686  ;;  %1696 = vrcp.f32 %v680_v8 }
 0x19b   : > { %1698 = vpow2.f32 %v1358_v10  ;;  %v1359_v13 = vmul.f32 -1.442695, %v2275_v11  ;;  %v1450_v14 = vpop.f32.mrb[20].mxu0  ;;  %v725_v18 = vmul.f32 %v1687_v12, %v2247_v24 }
 0x19c   : > { %v1689_v15 = vpop.eup %1688  ;;  %v1451_v16 = vpop.f32.mrb[21].mxu0 }
 0x19d   : > { %v1691_v17 = vpop.eup %1690  ;;  %v726_v19 = vmul.f32 %v1689_v15, %v2251_v27  ;;  %1700 = vpow2.f32 %v1359_v13  ;;  %v1452_v20 = vadd.f32 %v1451_v16, %v1450_v14  ;;  %v1453_v21 = vpop.f32.mrb[22].mxu0 }
 0x19e   : > { %v681_v22 = vadd.f32 1.0, %v1691_v17  ;;  %v1454_v23 = vpop.f32.mrb[23].mxu0 }
 0x19f   : > { %v1693_v25 = vpop.eup %1692  ;;  %v2281_v26 = vadd.f32 %v1452_v20, %v2242_v9  ;;  %v1455_v28 = vadd.f32 %v1454_v23, %v1453_v21  ;;  %v740_v29 = vpack.c.bf16 %v726_v19, %v725_v18 }
 0x1a0   : > { %1702 = vrcp.f32 %v681_v22  ;;  %v682_v30 = vadd.f32 1.0, %v1693_v25 }
 0x1a1   : > { %v1360_v31 = vmul.f32 -1.442695, %v2281_v26  ;;  %v2285_v32 = vadd.f32 %v1455_v28, %v2242_v9  ;;  %1517 = vmatmul.mubr.bf16.vlgmr.msra.gmra.mrb[0].mxu1 %v740_v29 }
 0x1a2   : > { %v1695_v24 = vpop.eup %1694  ;;  %1704 = vrcp.f32 %v682_v30 }
 0x1a3   : > { %1706 = vpow2.f32 %v1360_v31  ;;  %v1361_v27 = vmul.f32 -1.442695, %v2285_v32  ;;  %v1456_v33 = vpop.f32.mrb[24].mxu0  ;;  %v727_v38 = vmul.f32 %v1695_v24, %v2255_v37 }
 0x1a4   : > { %v1697_v34 = vpop.eup %1696  ;;  %v1457_v35 = vpop.f32.mrb[25].mxu0 }
 0x1a5   : > { %v1699_v36 = vpop.eup %1698  ;;  %v728_v39 = vmul.f32 %v1697_v34, %v2259_v41  ;;  %1708 = vpow2.f32 %v1361_v27  ;;  %v1458_v40 = vadd.f32 %v1457_v35, %v1456_v33  ;;  %v1459_v42 = vpop.f32.mrb[26].mxu0  ;;  %v1663_v35 = vld [vmem:[#allocation7 + $0x8] sm:$0xff]  }
 0x1a6   : > { %v683_v43 = vadd.f32 1.0, %v1699_v36  ;;  %v1460_v44 = vpop.f32.mrb[27].mxu0  ;;  %v1664_v36 = vld [vmem:[#allocation7 + $0x10] sm:$0xff]  }
 0x1a7   : > { %v1701_v45 = vpop.eup %1700  ;;  %v613_v46 = vadd.f32 %v1458_v40, %v2242_v9  ;;  %v1461_v47 = vadd.f32 %v1460_v44, %v1459_v42  ;;  %v741_v48 = vpack.c.bf16 %v728_v39, %v727_v38  ;;  %v1665_v38 = vld [vmem:[#allocation7 + $0x18] sm:$0xff]   ;;  %v1666_v39 = vld [vmem:[#allocation7 + $0x20] sm:$0xff]   ;;  %v1667_v40 = vld [vmem:[#allocation7 + $0x28] sm:$0xff]  }
 0x1a8   : > { %1710 = vrcp.f32 %v683_v43  ;;  %v684_v49 = vadd.f32 1.0, %v1701_v45  ;;  %v1668_v42 = vld [vmem:[#allocation7 + $0x30] sm:$0xff]   ;;  %v1669_v43 = vld [vmem:[#allocation7 + $0x38] sm:$0xff]   ;;  %v2303_v44 = vld [vmem:[%s2380_s4] ss:$0 sm:$0xff] }
 0x1a9   : > { %v1362_v50 = vmul.f32 -1.442695, %v613_v46  ;;  %v616_v52 = vadd.f32 %v1461_v47, %v2242_v9  ;;  %1520 = vmatprep.mubr.bf16.mxu1 %v741_v48 }
 0x1aa   : > { %v1703_v53 = vpop.eup %1702  ;;  %1712 = vrcp.f32 %v684_v49 }
 0x1ab   : > { %1714 = vpow2.f32 %v1362_v50  ;;  %v1363_v37 = vmul.f32 -1.442695, %v616_v52  ;;  %v1462_v41 = vpop.f32.mrb[28].mxu0  ;;  %v729_v58 = vmul.f32 %v1703_v53, %v2263_v51 }
 0x1ac   : > { %v1705_v54 = vpop.eup %1704  ;;  %v1463_v56 = vpop.f32.mrb[29].mxu0 }
 0x1ad   : > { %v1707_v57 = vpop.eup %1706  ;;  %v730_v59 = vmul.f32 %v1705_v54, %v2267_v55  ;;  %1716 = vpow2.f32 %v1363_v37  ;;  %v1464_v60 = vadd.f32 %v1463_v56, %v1462_v41  ;;  %v1465_v61 = vpop.f32.mrb[30].mxu0 }
 0x1ae   : > { %v685_v62 = vadd.f32 1.0, %v1707_v57  ;;  %v1466_v63 = vpop.f32.mrb[31].mxu0 }
 0x1af   : > { %v1709_v0 = vpop.eup %1708  ;;  %v621_v1 = vadd.f32 %v1464_v60, %v2242_v9  ;;  %v1467_v2 = vadd.f32 %v1466_v63, %v1465_v61  ;;  %v742_v3 = vpack.c.bf16 %v730_v59, %v729_v58 }
 0x1b0   : > { %1718 = vrcp.f32 %v685_v62  ;;  %v686_v4 = vadd.f32 1.0, %v1709_v0 }
 0x1b1   : > { %v1364_v6 = vmul.f32 -1.442695, %v621_v1  ;;  %v624_v7 = vadd.f32 %v1467_v2, %v2242_v9  ;;  %1521 = vmatmul.mubr.bf16.gmra.mrb[4].mxu1 %v742_v3 }
 0x1b2   : > { %v1711_v8 = vpop.eup %1710  ;;  %1720 = vrcp.f32 %v686_v4 }
 0x1b3   : > { %1722 = vpow2.f32 %v1364_v6  ;;  %v1365_v51 = vmul.f32 -1.442695, %v624_v7  ;;  %v731_v12 = vmul.f32 %v1711_v8, %v2271_v5 }
 0x1b4   : > { %v1713_v55 = vpop.eup %1712 }
 0x1b5   : > { %v1715_v10 = vpop.eup %1714  ;;  %v732_v13 = vmul.f32 %v1713_v55, %v2275_v11  ;;  %1724 = vpow2.f32 %v1365_v51 }
 0x1b6   : > { %v687_v14 = vadd.f32 1.0, %v1715_v10 }
 0x1b7   : > { %v1717_v15 = vpop.eup %1716  ;;  %v743_v16 = vpack.c.bf16 %v732_v13, %v731_v12 }
 0x1b8   : > { %1726 = vrcp.f32 %v687_v14  ;;  %v688_v17 = vadd.f32 1.0, %v1717_v15 }
 0x1b9   : > { %1524 = vmatprep.mubr.bf16.mxu1 %v743_v16 }
 0x1ba   : > { %v1719_v18 = vpop.eup %1718  ;;  %1728 = vrcp.f32 %v688_v17 }
 0x1bb   : > { %v733_v20 = vmul.f32 %v1719_v18, %v2281_v26 }
 0x1bc   : > { %v1721_v9 = vpop.eup %1720 }
 0x1bd   : > { %v1723_v19 = vpop.eup %1722  ;;  %v734_v21 = vmul.f32 %v1721_v9, %v2285_v32  ;;  %v1662_v32 = vld [vmem:[#allocation7] sm:$0xff]  }
 0x1be   : > { %v689_v22 = vadd.f32 1.0, %v1723_v19  ;;  %1532 = vmatprep.subr.bf16.mxu1 %v1662_v32 }
 0x1bf   : > { %v1725_v23 = vpop.eup %1724  ;;  %v744_v5 = vpack.c.bf16 %v734_v21, %v733_v20  ;;  %1533 = vmatpush3.bf16.msra.mxu1 %v1662_v32 }
 0x1c0   : > { %1730 = vrcp.f32 %v689_v22  ;;  %v690_v11 = vadd.f32 1.0, %v1725_v23  ;;  %1534 = vmatprep.subr.bf16.mxu1 %v1663_v35 }
 0x1c1   : > { %1525 = vmatmul.mubr.bf16.gmra.mrb[8].mxu1 %v744_v5 }
 0x1c2   : > { %v1727_v25 = vpop.eup %1726  ;;  %1732 = vrcp.f32 %v690_v11 }
 0x1c3   : > { %v735_v29 = vmul.f32 %v1727_v25, %v613_v46  ;;  %1535 = vmatpush3.bf16.msra.mxu1 %v1663_v35 }
 0x1c4   : > { %v1729_v28 = vpop.eup %1728  ;;  %1536 = vmatprep.subr.bf16.mxu1 %v1664_v36 }
 0x1c5   : > { %v736_v30 = vmul.f32 %v1729_v28, %v616_v52 }
 0x1c7   : > { %v745_v31 = vpack.c.bf16 %v736_v30, %v735_v29  ;;  %1537 = vmatpush3.bf16.msra.mxu1 %v1664_v36 }
 0x1c8   : > { %1538 = vmatprep.subr.bf16.mxu1 %v1665_v38 }
 0x1c9   : > { %1528 = vmatprep.mubr.bf16.mxu1 %v745_v31 }
 0x1ca   : > { %v1731_v24 = vpop.eup %1730 }
 0x1cb   : > { %v737_v33 = vmul.f32 %v1731_v24, %v621_v1  ;;  %1539 = vmatpush3.bf16.msra.mxu1 %v1665_v38 }
 0x1cc   : > { %v1733_v27 = vpop.eup %1732  ;;  %1540 = vmatprep.subr.bf16.mxu1 %v1666_v39 }
 0x1cd   : > { %v738_v34 = vmul.f32 %v1733_v27, %v624_v7 }
 0x1cf   : > { %v746_v26 = vpack.c.bf16 %v738_v34, %v737_v33  ;;  %1541 = vmatpush3.bf16.msra.mxu1 %v1666_v39 }
 0x1d0   : > { %1542 = vmatprep.subr.bf16.mxu1 %v1667_v40 }
 0x1d1   : > { %1529 = vmatmul.mubr.bf16.gmra.mrb[12].mxu1 %v746_v26 }
 0x1d3   : > { %1543 = vmatpush3.bf16.msra.mxu1 %v1667_v40 }
 0x1d4   : > { %1544 = vmatprep.subr.bf16.mxu1 %v1668_v42 }
 0x1d7   : > { %1545 = vmatpush3.bf16.msra.mxu1 %v1668_v42 }
 0x1d8   : > { %1546 = vmatprep.subr.bf16.mxu1 %v1669_v43 }
 0x1db   : > { %1547 = vmatpush3.bf16.msra.mxu1 %v1669_v43 }
 0x274   : > { %v1518_v45 = vpop.f32.mrb[0].mxu1 }
 0x275   : > { %v861_v46 = vadd.f32 %v1518_v45, %v2303_v44  ;;  %v852_v47 = vpop.f32.mrb[1].mxu1 }
 0x276   : > { %v853_v48 = vadd.f32 %v2303_v44, %v852_v47  ;;  %v1519_v49 = vpop.f32.mrb[2].mxu1 }
 0x277   : > { %v1377_v50 = vmul.f32 -1.442695, %v861_v46  ;;  %v864_v52 = vadd.f32 %v1519_v49, %v2303_v44  ;;  %v855_v53 = vpop.f32.mrb[3].mxu1 }
 0x278   : > { %v1375_v37 = vmul.f32 -1.442695, %v853_v48  ;;  %v856_v41 = vadd.f32 %v2303_v44, %v855_v53 }
 0x279   : > { %1734 = vpow2.f32 %v1377_v50  ;;  %v1378_v54 = vmul.f32 -1.442695, %v864_v52 }
 0x27a   : > { %1736 = vpow2.f32 %v1375_v37  ;;  %v1376_v56 = vmul.f32 -1.442695, %v856_v41 }
 0x27b   : > { %1738 = vpow2.f32 %v1378_v54 }
 0x27c   : > { %1740 = vpow2.f32 %v1376_v56 }
 0x283   : > { %v1735_v57 = vpop.eup %1734 }
 0x284   : > { %v1737_v58 = vpop.eup %1736  ;;  %v965_v59 = vadd.f32 1.0, %v1735_v57  ;;  %v1522_v60 = vpop.f32.mrb[4].mxu1 }
 0x285   : > { %v1739_v61 = vpop.eup %1738  ;;  %v963_v62 = vadd.f32 1.0, %v1737_v58  ;;  %v2310_v63 = vadd.f32 %v1522_v60, %v2303_v44  ;;  %v868_v0 = vpop.f32.mrb[5].mxu1 }
 0x286   : > { %v1741_v1 = vpop.eup %1740  ;;  %1742 = vrcp.f32 %v965_v59  ;;  %v966_v2 = vadd.f32 1.0, %v1739_v61  ;;  %v2313_v3 = vadd.f32 %v2303_v44, %v868_v0  ;;  %v1523_v4 = vpop.f32.mrb[6].mxu1 }
 0x287   : > { %1744 = vrcp.f32 %v963_v62  ;;  %v964_v6 = vadd.f32 1.0, %v1741_v1  ;;  %v1381_v7 = vmul.f32 -1.442695, %v2310_v63  ;;  %v880_v8 = vadd.f32 %v1523_v4, %v2303_v44  ;;  %v871_v51 = vpop.f32.mrb[7].mxu1 }
 0x288   : > { %1746 = vrcp.f32 %v966_v2  ;;  %v1379_v55 = vmul.f32 -1.442695, %v2313_v3  ;;  %v872_v10 = vadd.f32 %v2303_v44, %v871_v51 }
 0x289   : > { %1748 = vrcp.f32 %v964_v6  ;;  %v1382_v12 = vmul.f32 -1.442695, %v880_v8 }
 0x28a   : > { %1750 = vpow2.f32 %v1381_v7  ;;  %v1380_v13 = vmul.f32 -1.442695, %v872_v10 }
 0x28b   : > { %1752 = vpow2.f32 %v1379_v55 }
 0x28c   : > { %1754 = vpow2.f32 %v1382_v12 }
 0x28d   : > { %1756 = vpow2.f32 %v1380_v13 }
 0x290   : > { %v1743_v14 = vpop.eup %1742 }
 0x291   : > { %v1745_v15 = vpop.eup %1744  ;;  %v1013_v18 = vmul.f32 %v1743_v14, %v861_v46 }
 0x292   : > { %v1747_v16 = vpop.eup %1746  ;;  %v1011_v20 = vmul.f32 %v1745_v15, %v853_v48 }
 0x293   : > { %v1749_v17 = vpop.eup %1748  ;;  %v1014_v9 = vmul.f32 %v1747_v16, %v864_v52 }
 0x294   : > { %v1751_v19 = vpop.eup %1750  ;;  %v1012_v21 = vmul.f32 %v1749_v17, %v856_v41  ;;  %v1526_v22 = vpop.f32.mrb[8].mxu1 }
 0x295   : > { %v1753_v23 = vpop.eup %1752  ;;  %v1028_v5 = vpack.c.bf16 %v1014_v9, %v1013_v18  ;;  %v969_v11 = vadd.f32 1.0, %v1751_v19  ;;  %v2320_v25 = vadd.f32 %v1526_v22, %v2303_v44  ;;  %v884_v28 = vpop.f32.mrb[9].mxu1 }
 0x296   : > { %v1755_v29 = vpop.eup %1754  ;;  %v967_v30 = vadd.f32 1.0, %v1753_v23  ;;  %v2323_v31 = vadd.f32 %v2303_v44, %v884_v28  ;;  %v1527_v24 = vpop.f32.mrb[10].mxu1  ;;  %v1027_v27 = vpack.c.bf16 %v1012_v21, %v1011_v20 }
 0x297   : > { %v1757_v33 = vpop.eup %1756  ;;  %1758 = vrcp.f32 %v969_v11  ;;  %v970_v34 = vadd.f32 1.0, %v1755_v29  ;;  %v1385_v26 = vmul.f32 -1.442695, %v2320_v25  ;;  %v896_v32 = vadd.f32 %v1527_v24, %v2303_v44  ;;  %v887_v35 = vpop.f32.mrb[11].mxu1 }
 0x298   : > { %1760 = vrcp.f32 %v967_v30  ;;  %v968_v36 = vadd.f32 1.0, %v1757_v33  ;;  %v1383_v38 = vmul.f32 -1.442695, %v2323_v31  ;;  %v888_v39 = vadd.f32 %v2303_v44, %v887_v35  ;;  %1548 = vmatprep.mubr.bf16.mxu1 %v1027_v27  ;;  %v1391_v35 = vld [vmem:[%s2382_s6] ss:$0 sm:$0xff] }
 0x299   : > { %1762 = vrcp.f32 %v970_v34  ;;  %v1386_v40 = vmul.f32 -1.442695, %v896_v32  ;;  %1549 = vmatmul.mubr.bf16.vlgmr.msra.gmra.mrb[16].mxu1 %v1028_v5 }
 0x29a   : > { %1764 = vrcp.f32 %v968_v36  ;;  %v1384_v42 = vmul.f32 -1.442695, %v888_v39 }
 0x29b   : > { %1766 = vpow2.f32 %v1385_v26 }
 0x29c   : > { %1768 = vpow2.f32 %v1383_v38 }
 0x29d   : > { %1770 = vpow2.f32 %v1386_v40 }
 0x29e   : > { %1772 = vpow2.f32 %v1384_v42 }
 0x2a1   : > { %v1759_v43 = vpop.eup %1758 }
 0x2a2   : > { %v1761_v45 = vpop.eup %1760  ;;  %v1017_v48 = vmul.f32 %v1759_v43, %v2310_v63 }
 0x2a3   : > { %v1763_v46 = vpop.eup %1762  ;;  %v1015_v53 = vmul.f32 %v1761_v45, %v2313_v3 }
 0x2a4   : > { %v1765_v47 = vpop.eup %1764  ;;  %v1018_v49 = vmul.f32 %v1763_v46, %v880_v8  ;;  %v1530_v50 = vpop.f32.mrb[12].mxu1 }
 0x2a5   : > { %v1767_v52 = vpop.eup %1766  ;;  %v1016_v37 = vmul.f32 %v1765_v47, %v872_v10  ;;  %v909_v41 = vadd.f32 %v1530_v50, %v2303_v44  ;;  %v900_v54 = vpop.f32.mrb[13].mxu1 }
 0x2a6   : > { %v1769_v56 = vpop.eup %1768  ;;  %v973_v57 = vadd.f32 1.0, %v1767_v52  ;;  %v901_v58 = vadd.f32 %v2303_v44, %v900_v54  ;;  %v1531_v59 = vpop.f32.mrb[14].mxu1  ;;  %v1030_v60 = vpack.c.bf16 %v1018_v49, %v1017_v48 }
 0x2a7   : > { %v1771_v61 = vpop.eup %1770  ;;  %v971_v62 = vadd.f32 1.0, %v1769_v56  ;;  %v912_v0 = vadd.f32 %v1531_v59, %v2303_v44  ;;  %v903_v63 = vpop.f32.mrb[15].mxu1  ;;  %v1029_v1 = vpack.c.bf16 %v1016_v37, %v1015_v53  ;;  %v1389_v3 = vmul.f32 -1.442695, %v909_v41 }
 0x2a8   : > { %v1773_v2 = vpop.eup %1772  ;;  %1774 = vrcp.f32 %v973_v57  ;;  %v974_v4 = vadd.f32 1.0, %v1771_v61  ;;  %v904_v6 = vadd.f32 %v2303_v44, %v903_v63  ;;  %v1387_v8 = vmul.f32 -1.442695, %v901_v58 }
 0x2a9   : > { %1776 = vrcp.f32 %v971_v62  ;;  %v972_v7 = vadd.f32 1.0, %v1773_v2  ;;  %1552 = vmatprep.mubr.bf16.mxu1 %v1029_v1  ;;  %v1390_v51 = vmul.f32 -1.442695, %v912_v0 }
 0x2aa   : > { %1778 = vrcp.f32 %v974_v4  ;;  %1553 = vmatmul.mubr.bf16.gmra.mrb[20].mxu1 %v1030_v60  ;;  %v1388_v55 = vmul.f32 -1.442695, %v904_v6 }
 0x2ab   : > { %1780 = vrcp.f32 %v972_v7 }
 0x2ac   : > { %1782 = vpow2.f32 %v1389_v3 }
 0x2ad   : > { %1784 = vpow2.f32 %v1387_v8 }
 0x2ae   : > { %1786 = vpow2.f32 %v1390_v51 }
 0x2af   : > { %1788 = vpow2.f32 %v1388_v55 }
 0x2b2   : > { %v1775_v10 = vpop.eup %1774 }
 0x2b3   : > { %v1777_v12 = vpop.eup %1776  ;;  %v1021_v15 = vmul.f32 %v1775_v10, %v2320_v25 }
 0x2b4   : > { %v1779_v13 = vpop.eup %1778  ;;  %v1019_v17 = vmul.f32 %v1777_v12, %v2323_v31 }
 0x2b5   : > { %v1781_v14 = vpop.eup %1780  ;;  %v1022_v44 = vmul.f32 %v1779_v13, %v896_v32 }
 0x2b6   : > { %v1783_v16 = vpop.eup %1782  ;;  %v1020_v18 = vmul.f32 %v1781_v14, %v888_v39 }
 0x2b7   : > { %v1785_v9 = vpop.eup %1784  ;;  %v977_v19 = vadd.f32 1.0, %v1783_v16  ;;  %v1032_v20 = vpack.c.bf16 %v1022_v44, %v1021_v15 }
 0x2b8   : > { %v1787_v21 = vpop.eup %1786  ;;  %v975_v22 = vadd.f32 1.0, %v1785_v9  ;;  %v1031_v23 = vpack.c.bf16 %v1020_v18, %v1019_v17 }
 0x2b9   : > { %v1789_v5 = vpop.eup %1788  ;;  %1790 = vrcp.f32 %v977_v19  ;;  %v978_v11 = vadd.f32 1.0, %v1787_v21 }
 0x2ba   : > { %1792 = vrcp.f32 %v975_v22  ;;  %v976_v28 = vadd.f32 1.0, %v1789_v5  ;;  %1556 = vmatprep.mubr.bf16.mxu1 %v1031_v23 }
 0x2bb   : > { %1794 = vrcp.f32 %v978_v11  ;;  %1557 = vmatmul.mubr.bf16.gmra.mrb[24].mxu1 %v1032_v20 }
 0x2bc   : > { %1796 = vrcp.f32 %v976_v28 }
 0x2c3   : > { %v1791_v25 = vpop.eup %1790 }
 0x2c4   : > { %v1793_v29 = vpop.eup %1792  ;;  %v1025_v24 = vmul.f32 %v1791_v25, %v909_v41 }
 0x2c5   : > { %v1795_v30 = vpop.eup %1794  ;;  %v1023_v33 = vmul.f32 %v1793_v29, %v901_v58 }
 0x2c6   : > { %v1797_v31 = vpop.eup %1796  ;;  %v1026_v27 = vmul.f32 %v1795_v30, %v912_v0 }
 0x2c7   : > { %v1024_v34 = vmul.f32 %v1797_v31, %v904_v6 }
 0x2c8   : > { %v1034_v26 = vpack.c.bf16 %v1026_v27, %v1025_v24 }
 0x2c9   : > { %v1033_v32 = vpack.c.bf16 %v1024_v34, %v1023_v33 }
 0x2cb   : > { %1560 = vmatprep.mubr.bf16.mxu1 %v1033_v32 }
 0x2cc   : > { %1561 = vmatmul.mubr.bf16.gmra.mrb[28].mxu1 %v1034_v26 }
 0x36c   : > { %v1550_v36 = vpop.f32.mrb[16].mxu1 }
 0x36d   : > { %v1149_v38 = vadd.f32 %v1550_v36, %v1391_v35  ;;  %v1140_v39 = vpop.f32.mrb[17].mxu1 }
 0x36e   : > { %v1141_v40 = vadd.f32 %v1391_v35, %v1140_v39  ;;  %v1551_v42 = vpop.f32.mrb[18].mxu1 }
 0x36f   : > { %1205 = vst [vmem:[%s2345_s15 + $0x10] sm:$0xff] %v1149_v38  ;;  %v1152_v43 = vadd.f32 %v1551_v42, %v1391_v35  ;;  %v1143_v45 = vpop.f32.mrb[19].mxu1 }
 0x370   : > { %1203 = vst [vmem:[%s2345_s15] sm:$0xff] %v1141_v40  ;;  %v1144_v46 = vadd.f32 %v1391_v35, %v1143_v45 }
 0x371   : > { %1206 = vst [vmem:[%s2345_s15 + $0x18] sm:$0xff] %v1152_v43 }
 0x372   : > { %1204 = vst [vmem:[%s2345_s15 + $0x8] sm:$0xff] %v1144_v46 }
 0x37d   : > { %v1554_v47 = vpop.f32.mrb[20].mxu1 }
 0x37e   : > { %v1165_v48 = vadd.f32 %v1554_v47, %v1391_v35  ;;  %v1156_v49 = vpop.f32.mrb[21].mxu1 }
 0x37f   : > { %v1157_v50 = vadd.f32 %v1391_v35, %v1156_v49  ;;  %v1555_v52 = vpop.f32.mrb[22].mxu1 }
 0x380   : > { %1209 = vst [vmem:[%s2345_s15 + $0x30] sm:$0xff] %v1165_v48  ;;  %v1168_v53 = vadd.f32 %v1555_v52, %v1391_v35  ;;  %v1159_v37 = vpop.f32.mrb[23].mxu1 }
 0x381   : > { %1207 = vst [vmem:[%s2345_s15 + $0x20] sm:$0xff] %v1157_v50  ;;  %v1160_v41 = vadd.f32 %v1391_v35, %v1159_v37 }
 0x382   : > { %1210 = vst [vmem:[%s2345_s15 + $0x38] sm:$0xff] %v1168_v53 }
 0x383   : > { %1208 = vst [vmem:[%s2345_s15 + $0x28] sm:$0xff] %v1160_v41 }
 0x38e   : > { %v1558_v54 = vpop.f32.mrb[24].mxu1 }
 0x38f   : > { %v1181_v56 = vadd.f32 %v1558_v54, %v1391_v35  ;;  %v1172_v57 = vpop.f32.mrb[25].mxu1 }
 0x390   : > { %v1173_v58 = vadd.f32 %v1391_v35, %v1172_v57  ;;  %v1559_v59 = vpop.f32.mrb[26].mxu1 }
 0x391   : > { %1213 = vst [vmem:[%s2345_s15 + $0x50] sm:$0xff] %v1181_v56  ;;  %v1184_v60 = vadd.f32 %v1559_v59, %v1391_v35  ;;  %v1175_v61 = vpop.f32.mrb[27].mxu1 }
 0x392   : > { %1211 = vst [vmem:[%s2345_s15 + $0x40] sm:$0xff] %v1173_v58  ;;  %v1176_v62 = vadd.f32 %v1391_v35, %v1175_v61 }
 0x393   : > { %1214 = vst [vmem:[%s2345_s15 + $0x58] sm:$0xff] %v1184_v60 }
 0x394   : > { %1212 = vst [vmem:[%s2345_s15 + $0x48] sm:$0xff] %v1176_v62 }
 0x39f   : > { %v1562_v0 = vpop.f32.mrb[28].mxu1 }
 0x3a0   : > { %v1197_v63 = vadd.f32 %v1562_v0, %v1391_v35  ;;  %v1188_v1 = vpop.f32.mrb[29].mxu1 }
 0x3a1   : > { %v1189_v2 = vadd.f32 %v1391_v35, %v1188_v1  ;;  %v1563_v4 = vpop.f32.mrb[30].mxu1 }
 0x3a2   : > { %1217 = vst [vmem:[%s2345_s15 + $0x70] sm:$0xff] %v1197_v63  ;;  %v1200_v3 = vadd.f32 %v1563_v4, %v1391_v35  ;;  %v1191_v6 = vpop.f32.mrb[31].mxu1 }
 0x3a3   : > { %1215 = vst [vmem:[%s2345_s15 + $0x60] sm:$0xff] %v1189_v2  ;;  %v1192_v7 = vadd.f32 %v1391_v35, %v1191_v6 }
 0x3a4   : > { %1218 = vst [vmem:[%s2345_s15 + $0x78] sm:$0xff] %v1200_v3 }
 0x3a5   : > { %1216 = vst [vmem:[%s2345_s15 + $0x68] sm:$0xff] %v1192_v7 }
 0x3a6 PF: > { %p19_p11 = scmp.ge.s32.totalorder %s2137_s21, 4   ;;  %s2397_s24 = smov %s1946_s25 }
 0x3a7   : > { %s2398_s25 = smov %s1950_s26  ;;  %s2399_s26 = smov %s2147_s17 }
 0x3a8   : > { %s2400_s27 = smov %s2137_s21  ;;  %21 = sbr.rel (!%p19_p11) target bundleno = 5 (0x5), region = 100 }
 0x3af   :  { %1241 = vsyncpa [#allocation3], 1 }
 0x3b0   :  { %1243 = vsyncpa [#allocation3 + $0x1], 1 }
 0x3b1   :  { %1244 = vsyncpa [#allocation5], 1 }
 0x3b2   :  { %1245 = vsyncpa [#allocation8], 1 }

</bundles_post_ra>
